<compile_context>
chip_gen: v6e
topology: v6e:2x2x1
jax: 0.10.0
libtpu: 0.0.40
codegen_flags: <defaults>
</compile_context>

<pallas_src>
import functools

import jax
import jax.numpy as jnp
from jax.experimental import pallas as pl
from jax.experimental.pallas import tpu as pltpu


def _round_up(n: int, m: int) -> int:
    return (n + m - 1) // m * m


def _ff_kernel(x_ref, w1_ref, b1_ref, w2_ref, b2_ref, o_ref, acc_ref):
    # x_ref:  (tm, dp)  bf16          w1_ref: (dp, th)  bf16
    # b1_ref: (1, th)   f32           w2_ref: (th, dp)  bf16
    # b2_ref: (1, dp)   f32           o_ref:  (tm, dp)  out dtype
    # acc_ref:(tm, dp)  f32 scratch, resident across the hidden grid axis
    h_idx = pl.program_id(1)

    @pl.when(h_idx == 0)
    def _init():
        # Fold the second bias into the accumulator init (added exactly once).
        acc_ref[...] = jnp.broadcast_to(b2_ref[...], acc_ref.shape)

    # First matmul + bias, f32 accumulation on the MXU.
    h = jnp.dot(x_ref[...], w1_ref[...],
                preferred_element_type=jnp.float32) + b1_ref[...]
    # tanh-form GELU lowers to the EUP slot (exact erf is a long VPU polynomial).
    h = jax.nn.gelu(h, approximate=True)

    # Second matmul: partial sum over this hidden tile into the f32 accumulator.
    acc_ref[...] += jnp.dot(h.astype(w2_ref.dtype), w2_ref[...],
                            preferred_element_type=jnp.float32)

    # TODO(synk): dropout is identity in eval mode; training-mode dropout would
    # use pltpu.prng_seed / pltpu.prng_random_bits + stochastic masking here.

    @pl.when(h_idx == pl.num_programs(1) - 1)
    def _store():
        o_ref[...] = acc_ref[...].astype(o_ref.dtype)


@functools.partial(jax.jit, static_argnames=("block_rows", "block_hidden"))
def feed_forward(x, w1, b1, w2, b2, *, block_rows=256, block_hidden=512):
    """x: (..., d_in); w1: (d_in, d_hid); w2: (d_hid, d_in). Returns x.shape/x.dtype."""
    orig_shape = x.shape
    out_dtype = x.dtype
    d_in = orig_shape[-1]
    d_hid = w1.shape[1]

    x2 = x.reshape(-1, d_in)
    m = x2.shape[0]

    # ---- Tile-size / padding arithmetic (all static) -------------------------
    block_rows = _round_up(int(block_rows), 8)
    block_hidden = _round_up(int(block_hidden), 128)

    dp = _round_up(d_in, 128)                 # lane-dense feature dim
    hp = _round_up(d_hid, 128)                # lane-dense hidden dim
    th = hp if hp <= block_hidden else block_hidden
    hp = _round_up(hp, th)

    tm = min(block_rows, _round_up(m, 8))     # row tile (sublane aligned)
    mp = _round_up(m, tm)                     # padded token count

    # ---- Cast / pad operands (bf16 for the MXU, f32 biases) ------------------
    x_p = jnp.pad(x2, ((0, mp - m), (0, dp - d_in))).astype(jnp.bfloat16)
    w1_p = jnp.pad(w1, ((0, dp - d_in), (0, hp - d_hid))).astype(jnp.bfloat16)
    w2_p = jnp.pad(w2, ((0, hp - d_hid), (0, dp - d_in))).astype(jnp.bfloat16)
    b1_p = jnp.pad(b1.astype(jnp.float32), (0, hp - d_hid)).reshape(1, hp)
    b2_p = jnp.pad(b2.astype(jnp.float32), (0, dp - d_in)).reshape(1, dp)

    grid = (mp // tm, hp // th)               # reduction (hidden) axis last

    out_itemsize = jnp.dtype(out_dtype).itemsize
    # Double-buffered blocks + resident f32 accumulator, with headroom.
    est = 2 * (tm * dp * 2                    # x tile (bf16)
               + dp * th * 2                  # W1 tile
               + th * 4                       # b1 tile
               + th * dp * 2                  # W2 tile
               + dp * 4                       # b2 tile
               + tm * dp * out_itemsize)      # out tile
    est += tm * dp * 4                        # accumulator scratch
    vmem_bytes = min(max(int(est * 1.5), 32 << 20), 64 << 20)

    cost = pl.CostEstimate(
        flops=4 * m * d_in * d_hid,           # two matmuls
        transcendentals=m * d_hid,            # one tanh per hidden activation
        bytes_accessed=(x2.size * 2 + w1.size * 2 + w2.size * 2
                        + m * d_in * out_itemsize
                        + (b1.size + b2.size) * 4),
    )

    out = pl.pallas_call(
        _ff_kernel,
        out_shape=jax.ShapeDtypeStruct((mp, dp), out_dtype),
        grid_spec=pltpu.PrefetchScalarGridSpec(
            num_scalar_prefetch=0,
            grid=grid,
            in_specs=[
                pl.BlockSpec((tm, dp), lambda i, h: (i, 0)),   # x (resident over h)
                pl.BlockSpec((dp, th), lambda i, h: (0, h)),   # W1
                pl.BlockSpec((1, th), lambda i, h: (0, h)),    # b1
                pl.BlockSpec((th, dp), lambda i, h: (h, 0)),   # W2
                pl.BlockSpec((1, dp), lambda i, h: (0, 0)),    # b2
            ],
            out_specs=pl.BlockSpec((tm, dp), lambda i, h: (i, 0)),
            scratch_shapes=[pltpu.VMEM((tm, dp), jnp.float32)],
        ),
        compiler_params=pltpu.CompilerParams(
            dimension_semantics=("parallel", "arbitrary"),
            vmem_limit_bytes=vmem_bytes,
        ),
        cost_estimate=cost,
    )(x_p, w1_p, b1_p, w2_p, b2_p)

    return out[:m, :d_in].reshape(orig_shape)


def _reference(x, w1, b1, w2, b2):
    # Module semantics: exact (erf) GELU, f32 math.
    h = jax.nn.gelu(x @ w1 + b1, approximate=False)
    return h @ w2 + b2


def _make_params(key, in_channels, hid_channels):
    kw1, kb1, kw2, kb2 = jax.random.split(key, 4)
    # nn.Linear weights are (out, in); pre-transpose to (in, out) for the kernel.
    w1 = (jax.random.normal(kw1, (hid_channels, in_channels), jnp.float32) * 0.05).T
    b1 = jax.random.normal(kb1, (hid_channels,), jnp.float32) * 0.05
    w2 = (jax.random.normal(kw2, (in_channels, hid_channels), jnp.float32) * 0.05).T
    b2 = jax.random.normal(kb2, (in_channels,), jnp.float32) * 0.05
    return w1, b1, w2, b2


if __name__ == "__main__":
    key = jax.random.PRNGKey(0)

    # --- Test 1: lane-dense ViT-style config (single tile) -------------------
    in_channels, hid_channels, batch, seq = 128, 256, 2, 8
    k1, k2, key = jax.random.split(key, 3)
    w1, b1, w2, b2 = _make_params(k1, in_channels, hid_channels)
    x = jax.random.normal(k2, (batch, seq, in_channels), jnp.float32)

    y = jax.block_until_ready(feed_forward(x, w1, b1, w2, b2))
    y_ref = _reference(x, w1, b1, w2, b2)
    assert y.shape == x.shape and y.dtype == x.dtype
    assert jnp.allclose(y, y_ref, atol=2e-2, rtol=2e-2), "test1 mismatch vs reference"

    # --- Test 2: ragged dims -> padding + multi-step (rows, hidden) grid -----
    in_channels, hid_channels, batch, seq = 96, 320, 3, 50
    k1, k2, _ = jax.random.split(key, 3)
    w1, b1, w2, b2 = _make_params(k1, in_channels, hid_channels)
    x = jax.random.normal(k2, (batch, seq, in_channels), jnp.float32)

    y = jax.block_until_ready(
        feed_forward(x, w1, b1, w2, b2, block_rows=64, block_hidden=128))
    y_ref = _reference(x, w1, b1, w2, b2)
    assert y.shape == x.shape and y.dtype == x.dtype
    assert jnp.allclose(y, y_ref, atol=2e-2, rtol=2e-2), "test2 mismatch vs reference"

    print("KERNEL_OK")
</pallas_src>

<mosaic_0001>
module attributes {stable_mosaic.version = 11 : i64} {
  func.func @_ff_kernel(%arg0: i32, %arg1: i32, %arg2: memref<16x128xbf16, #tpu.memory_space<vmem>>, %arg3: memref<128x256xbf16, #tpu.memory_space<vmem>>, %arg4: memref<1x256xf32, #tpu.memory_space<vmem>>, %arg5: memref<256x128xbf16, #tpu.memory_space<vmem>>, %arg6: memref<1x128xf32, #tpu.memory_space<vmem>>, %arg7: memref<16x128xf32, #tpu.memory_space<vmem>>, %arg8: memref<16x128xf32, #tpu.memory_space<vmem>>) attributes {dimension_semantics = [#tpu.dimension_semantics<parallel>, #tpu.dimension_semantics<arbitrary>], iteration_bounds = array<i64: 1, 1>, scalar_prefetch = 0 : i64, scratch_operands = 1 : i64, tpu.core_type = #tpu.core_type<tc>, window_params = [{transform_indices = @transform_0, window_bounds = array<i64: 16, 128>}, {transform_indices = @transform_1, window_bounds = array<i64: 128, 256>}, {transform_indices = @transform_2, window_bounds = array<i64: 1, 256>}, {transform_indices = @transform_3, window_bounds = array<i64: 256, 128>}, {pipeline_mode = #tpu.pipeline_mode<synchronous>, transform_indices = @transform_4, window_bounds = array<i64: 1, 128>}, {transform_indices = @transform_5, window_bounds = array<i64: 16, 128>}]} {
    %c0_i32 = arith.constant 0 : i32
    %0 = arith.cmpi eq, %arg1, %c0_i32 : i32
    %1 = arith.extui %0 : i1 to i32
    %c0_i32_0 = arith.constant 0 : i32
    %2 = arith.cmpi ne, %1, %c0_i32_0 : i32
    scf.if %2 {
      %c0_19 = arith.constant 0 : index
      %c0_20 = arith.constant 0 : index
      %31 = vector.load %arg6[%c0_19, %c0_20] : memref<1x128xf32, #tpu.memory_space<vmem>>, vector<1x128xf32>
      %32 = vector.shape_cast %31 : vector<1x128xf32> to vector<1x128xf32>
      %33 = vector.broadcast %32 : vector<1x128xf32> to vector<16x128xf32>
      %c0_21 = arith.constant 0 : index
      %c0_22 = arith.constant 0 : index
      %34 = vector.load %arg8[%c0_21, %c0_22] : memref<16x128xf32, #tpu.memory_space<vmem>>, vector<16x128xf32>
      tpu.vector_store %arg8[%c0_21, %c0_22], %33 {strides = array<i32>} : memref<16x128xf32, #tpu.memory_space<vmem>>, vector<16x128xf32>,
    } else {
    }
    %c0 = arith.constant 0 : index
    %c0_1 = arith.constant 0 : index
    %3 = vector.load %arg2[%c0, %c0_1] : memref<16x128xbf16, #tpu.memory_space<vmem>>, vector<16x128xbf16>
    %c0_2 = arith.constant 0 : index
    %c0_3 = arith.constant 0 : index
    %4 = vector.load %arg3[%c0_2, %c0_3] : memref<128x256xbf16, #tpu.memory_space<vmem>>, vector<128x256xbf16>
    %cst = arith.constant dense<0.000000e+00> : vector<16x256xf32>
    %5 = tpu.matmul %3, %4, %cst {dimension_numbers = #tpu.dot_dimension_numbers<[1], [0], [0], [1], [0, 0, 1, 1], [], []>} : vector<16x128xbf16>, vector<128x256xbf16>, vector<16x256xf32> -> vector<16x256xf32>
    %c0_4 = arith.constant 0 : index
    %c0_5 = arith.constant 0 : index
    %6 = vector.load %arg4[%c0_4, %c0_5] : memref<1x256xf32, #tpu.memory_space<vmem>>, vector<1x256xf32>
    %7 = vector.broadcast %6 : vector<1x256xf32> to vector<16x256xf32>
    %8 = arith.addf %5, %7 : vector<16x256xf32>
    %9 = arith.mulf %8, %8 : vector<16x256xf32>
    %10 = arith.mulf %8, %9 : vector<16x256xf32>
    %cst_6 = arith.constant 4.471500e-02 : f32
    %11 = vector.broadcast %cst_6 : f32 to vector<16x256xf32>
    %12 = arith.mulf %11, %10 : vector<16x256xf32>
    %13 = arith.addf %8, %12 : vector<16x256xf32>
    %cst_7 = arith.constant 0.797884583 : f32
    %14 = vector.broadcast %cst_7 : f32 to vector<16x256xf32>
    %15 = arith.mulf %14, %13 : vector<16x256xf32>
    %16 = math.tanh %15 : vector<16x256xf32>
    %cst_8 = arith.constant 1.000000e+00 : f32
    %17 = vector.broadcast %cst_8 : f32 to vector<16x256xf32>
    %18 = arith.addf %17, %16 : vector<16x256xf32>
    %cst_9 = arith.constant 5.000000e-01 : f32
    %19 = vector.broadcast %cst_9 : f32 to vector<16x256xf32>
    %20 = arith.mulf %19, %18 : vector<16x256xf32>
    %21 = arith.mulf %8, %20 : vector<16x256xf32>
    %c0_10 = arith.constant 0 : index
    %c0_11 = arith.constant 0 : index
    %22 = vector.load %arg8[%c0_10, %c0_11] : memref<16x128xf32, #tpu.memory_space<vmem>>, vector<16x128xf32>
    %23 = arith.truncf %21 : vector<16x256xf32> to vector<16x256xbf16>
    %c0_12 = arith.constant 0 : index
    %c0_13 = arith.constant 0 : index
    %24 = vector.load %arg5[%c0_12, %c0_13] : memref<256x128xbf16, #tpu.memory_space<vmem>>, vector<256x128xbf16>
    %cst_14 = arith.constant dense<0.000000e+00> : vector<16x128xf32>
    %25 = tpu.matmul %23, %24, %cst_14 {dimension_numbers = #tpu.dot_dimension_numbers<[1], [0], [0], [1], [0, 0, 1, 1], [], []>} : vector<16x256xbf16>, vector<256x128xbf16>, vector<16x128xf32> -> vector<16x128xf32>
    %26 = arith.addf %22, %25 : vector<16x128xf32>
    %c0_15 = arith.constant 0 : index
    %c0_16 = arith.constant 0 : index
    %27 = vector.load %arg8[%c0_15, %c0_16] : memref<16x128xf32, #tpu.memory_space<vmem>>, vector<16x128xf32>
    tpu.vector_store %arg8[%c0_15, %c0_16], %26 {strides = array<i32>} : memref<16x128xf32, #tpu.memory_space<vmem>>, vector<16x128xf32>,
    %c0_i32_17 = arith.constant 0 : i32
    %28 = arith.cmpi eq, %arg1, %c0_i32_17 : i32
    %29 = arith.extui %28 : i1 to i32
    %c0_i32_18 = arith.constant 0 : i32
    %30 = arith.cmpi ne, %29, %c0_i32_18 : i32
    scf.if %30 {
      %c0_19 = arith.constant 0 : index
      %c0_20 = arith.constant 0 : index
      %31 = vector.load %arg8[%c0_19, %c0_20] : memref<16x128xf32, #tpu.memory_space<vmem>>, vector<16x128xf32>
      %c0_21 = arith.constant 0 : index
      %c0_22 = arith.constant 0 : index
      %32 = vector.load %arg7[%c0_21, %c0_22] : memref<16x128xf32, #tpu.memory_space<vmem>>, vector<16x128xf32>
      tpu.vector_store %arg7[%c0_21, %c0_22], %31 {strides = array<i32>} : memref<16x128xf32, #tpu.memory_space<vmem>>, vector<16x128xf32>,
    } else {
    }
    return
  }
  func.func @transform_0(%arg0: i32, %arg1: i32) -> (i32, i32) {
    %c0_i32 = arith.constant 0 : i32
    %c0_i32_0 = arith.constant 0 : i32
    return %arg0, %c0_i32 : i32, i32
  }
  func.func @transform_1(%arg0: i32, %arg1: i32) -> (i32, i32) {
    %c0_i32 = arith.constant 0 : i32
    %c0_i32_0 = arith.constant 0 : i32
    return %c0_i32, %arg1 : i32, i32
  }
  func.func @transform_2(%arg0: i32, %arg1: i32) -> (i32, i32) {
    %c0_i32 = arith.constant 0 : i32
    %c0_i32_0 = arith.constant 0 : i32
    return %c0_i32, %arg1 : i32, i32
  }
  func.func @transform_3(%arg0: i32, %arg1: i32) -> (i32, i32) {
    %c0_i32 = arith.constant 0 : i32
    %c0_i32_0 = arith.constant 0 : i32
    return %arg1, %c0_i32 : i32, i32
  }
  func.func @transform_4(%arg0: i32, %arg1: i32) -> (i32, i32) {
    %c0_i32 = arith.constant 0 : i32
    %c0_i32_0 = arith.constant 0 : i32
    %c0_i32_1 = arith.constant 0 : i32
    return %c0_i32, %c0_i32_0 : i32, i32
  }
  func.func @transform_5(%arg0: i32, %arg1: i32) -> (i32, i32) {
    %c0_i32 = arith.constant 0 : i32
    %c0_i32_0 = arith.constant 0 : i32
    return %arg0, %c0_i32 : i32, i32
  }
}

</mosaic_0001>

<bundles_post_ra>
// kernel: feed_forward.1
= control target key start
LH: loop header
LB: loop body
LE: loop exit
PB: predicated region body
PF: predicated region fallthrough
CT: control target
= control target key end

     0   :  { %v561_v2 = vmov 0   ;;  %s703_s0 = inlined_call_operand.vmem [shape: bf16[16,128], index: 0, kind: input, shape index: {}]   ;;  %s704_s1 = inlined_call_operand.vmem [shape: bf16[128,256], index: 1, kind: input, shape index: {}]   ;;  %s705_s2 = inlined_call_operand.vmem [shape: f32[1,256], index: 2, kind: input, shape index: {}]   ;;  %s706_s3 = inlined_call_operand.vmem [shape: bf16[256,128], index: 3, kind: input, shape index: {}]   ;;  %s707_s4 = inlined_call_operand.vmem [shape: f32[1,128], index: 4, kind: input, shape index: {}]   ;;  %s708_s5 = inlined_call_operand.hbm [shape: f32[16,128], index: 5, kind: output, shape index: {}]  }
   0x1   :  { %v490_v0 = vld [vmem:[%s704_s1 + $0x74] ss:$8 sps:$4 sm:$0xff]   ;;  %v492_v1 = vld [vmem:[%s704_s1 + $0x70] ss:$8 sps:$4 sm:$0xff]   ;;  %183 = vmatprep.mubr.bf16.mxu0 %v561_v2  ;;  %v493_v3 = vld [vmem:[%s704_s1 + $0x64] ss:$8 sps:$4 sm:$0xff]  }
   0x2   :  { %151 = vmatprep.subr.bf16.mxu0 %v490_v0  ;;  %v495_v4 = vld [vmem:[%s704_s1 + $0x60] ss:$8 sps:$4 sm:$0xff]   ;;  %v496_v5 = vld [vmem:[%s704_s1 + $0x54] ss:$8 sps:$4 sm:$0xff]   ;;  %v498_v6 = vld [vmem:[%s704_s1 + $0x50] ss:$8 sps:$4 sm:$0xff]  }
   0x3   :  { %152 = vmatpush1.bf16.msra.mxu0 %v492_v1  ;;  %v499_v7 = vld [vmem:[%s704_s1 + $0x44] ss:$8 sps:$4 sm:$0xff]   ;;  %v501_v8 = vld [vmem:[%s704_s1 + $0x40] ss:$8 sps:$4 sm:$0xff]   ;;  %v502_v9 = vld [vmem:[%s704_s1 + $0x34] ss:$8 sps:$4 sm:$0xff]  }
   0x4   :  { %153 = vmatprep.subr.bf16.mxu0 %v493_v3  ;;  %v504_v10 = vld [vmem:[%s704_s1 + $0x30] ss:$8 sps:$4 sm:$0xff]   ;;  %v505_v11 = vld [vmem:[%s704_s1 + $0x24] ss:$8 sps:$4 sm:$0xff]   ;;  %v507_v12 = vld [vmem:[%s704_s1 + $0x20] ss:$8 sps:$4 sm:$0xff]  }
   0x5   :  { %v508_v13 = vld [vmem:[%s704_s1 + $0x14] ss:$8 sps:$4 sm:$0xff]  }
   0x7   :  { %154 = vmatpush1.bf16.msra.mxu0 %v495_v4 }
   0x8   :  { %155 = vmatprep.subr.bf16.mxu0 %v496_v5 }
   0xb   :  { %156 = vmatpush1.bf16.msra.mxu0 %v498_v6 }
   0xc   :  { %157 = vmatprep.subr.bf16.mxu0 %v499_v7 }
   0xf   :  { %158 = vmatpush1.bf16.msra.mxu0 %v501_v8 }
  0x10   :  { %159 = vmatprep.subr.bf16.mxu0 %v502_v9 }
  0x13   :  { %160 = vmatpush1.bf16.msra.mxu0 %v504_v10 }
  0x14   :  { %161 = vmatprep.subr.bf16.mxu0 %v505_v11 }
  0x15   :  { %10 = vsyncpa [#allocation4], 0  ;;  %v510_v14 = vld [vmem:[%s704_s1 + $0x10] ss:$8 sps:$4 sm:$0xff]   ;;  %v511_v15 = vld [vmem:[%s704_s1 + $0x4] ss:$8 sps:$4 sm:$0xff]   ;;  %v55_v34 = vlaneseq }
  0x16   :  { %v513_v16 = vld [vmem:[%s704_s1] ss:$8 sps:$4 sm:$0xff]   ;;  %v515_v18 = vld [vmem:[%s706_s3 + $0x78] sm:$0xff]   ;;  %v517_v20 = vld [vmem:[%s706_s3 + $0x70] sm:$0xff]   ;;  %s562_s8 = smov [#allocation3]  }
  0x17   :  { %162 = vmatpush1.bf16.msra.mxu0 %v507_v12  ;;  %v514_v17 = vld [vmem:[%s703_s0] sm:$0xff]   ;;  %v516_v19 = vld [vmem:[%s706_s3 + $0x38] sm:$0xff]   ;;  %464 = vmatprep.subr.bf16.mxu1 %v515_v18  ;;  %v518_v21 = vld [vmem:[%s706_s3 + $0x30] sm:$0xff]   ;;  %v56_v35 = vshrl.u32 %v55_v34, 7  ;;  %s419_s0 = sshll.u32 %s562_s8, 4  ;;  %s420_s0 = int_to_ptr.vmem [resolvable:$true] %s419_s0 }
  0x18   :  { %163 = vmatprep.subr.bf16.mxu0 %v508_v13  ;;  %465 = vmatpush3.bf16.msra.mxu1 %v516_v19  ;;  %v519_v22 = vld [vmem:[%s706_s3 + $0x68] sm:$0xff]   ;;  %v521_v24 = vld [vmem:[%s706_s3 + $0x60] sm:$0xff]   ;;  %v523_v26 = vld [vmem:[%s706_s3 + $0x58] sm:$0xff]   ;;  %s539_s9 = scalar_lea.vmem %s420_s0, 256  ;;  %p544_p1 = scmp.lt.s32.totalorder %s420_s0, %s420_s0 }
  0x19   :  { %466 = vmatprep.subr.bf16.mxu1 %v517_v20  ;;  %v520_v23 = vld [vmem:[%s706_s3 + $0x28] sm:$0xff]   ;;  %v522_v25 = vld [vmem:[%s706_s3 + $0x20] sm:$0xff]   ;;  %v524_v27 = vld [vmem:[%s706_s3 + $0x18] sm:$0xff]   ;;  %v57_v36 = vsub.s32 0, %v56_v35  ;;  %v61_v38 = vsub.s32 1, %v56_v35  ;;  %p540_p0 = scmp.ne.s32.totalorder %s420_s0, %s539_s9  ;;  %p545_p2 = scmp.lt.s32.totalorder %s539_s9, %s539_s9 }
  0x1a   :  { %v525_v28 = vld [vmem:[%s706_s3 + $0x50] sm:$0xff]   ;;  %v527_v30 = vld [vmem:[%s706_s3 + $0x48] sm:$0xff]   ;;  %v529_v32 = vld [vmem:[%s706_s3 + $0x40] sm:$0xff]  }
  0x1b   :  { %164 = vmatpush1.bf16.msra.mxu0 %v510_v14  ;;  %v526_v29 = vld [vmem:[%s706_s3 + $0x10] sm:$0xff]   ;;  %v528_v31 = vld [vmem:[%s706_s3 + $0x8] sm:$0xff]   ;;  %v530_v33 = vld [vmem:[%s706_s3] sm:$0xff]   ;;  %p546_p3 = por %p545_p2, %p544_p1 }
  0x1c   :  { %165 = vmatprep.subr.bf16.mxu0 %v511_v15  ;;  %467 = vmatpush3.bf16.msra.mxu1 %v518_v21  ;;  %v53_v37 = vld [vmem:[%s705_s2] sm:$0x3] }
  0x1d   :  { %468 = vmatprep.subr.bf16.mxu1 %v519_v22  ;;  %v58_v39 = vrot.slane %v53_v37, %v57_v36  ;;  %v62_v40 = vrot.slane %v53_v37, %v61_v38  ;;  %p547_p4 = pnand %p546_p3, %p540_p0 }
  0x1f   :  { %166 = vmatpush1.bf16.msra.mxu0 %v513_v16 }
  0x20   :  { %469 = vmatpush3.bf16.msra.mxu1 %v520_v23 }
  0x21   :  { %470 = vmatprep.subr.bf16.mxu1 %v521_v24  ;;  %v430_v24 = vld [vmem:[%s707_s4] ss:$0 sm:$0xff] }
  0x22   :  { %184 = vmatmul.mubr.bf16.vlgmr.msra.gmra.mxu0 %v514_v17 }
  0x24   :  { %471 = vmatpush3.bf16.msra.mxu1 %v522_v25 }
  0x25   :  { %472 = vmatprep.subr.bf16.mxu1 %v523_v26 }
  0x28   :  { %473 = vmatpush3.bf16.msra.mxu1 %v524_v27 }
  0x29   :  { %474 = vmatprep.subr.bf16.mxu1 %v525_v28 }
  0x2c   :  { %475 = vmatpush3.bf16.msra.mxu1 %v526_v29 }
  0x2d   :  { %476 = vmatprep.subr.bf16.mxu1 %v527_v30 }
  0x30   :  { %477 = vmatpush3.bf16.msra.mxu1 %v528_v31 }
  0x31   :  { %478 = vmatprep.subr.bf16.mxu1 %v529_v32 }
  0x34   :  { %479 = vmatpush3.bf16.msra.mxu1 %v530_v33 }
  0xe2   :  { %v185_v41 = vpop.f32.mrf.mxu0 }
  0xe3   :  { %v186_v42 = vadd.f32 %v185_v41, %v58_v39 }
  0xe4   :  { %v187_v43 = vpop.f32.mrf.mxu0 }
  0xe5   :  { %v194_v44 = vmul.f32 %v186_v42, %v186_v42  ;;  %v188_v45 = vadd.f32 %v187_v43, %v62_v40 }
  0xe6   :  { %v189_v46 = vpop.f32.mrf.mxu0 }
  0xe7   :  { %v198_v47 = vmul.f32 %v194_v44, %v186_v42  ;;  %v195_v48 = vmul.f32 %v188_v45, %v188_v45  ;;  %v190_v49 = vadd.f32 %v189_v46, %v58_v39 }
  0xe8   :  { %v191_v50 = vpop.f32.mrf.mxu0 }
  0xe9   :  { %v202_v51 = vmul.f32 0.044715, %v198_v47  ;;  %v199_v52 = vmul.f32 %v195_v48, %v188_v45  ;;  %v196_v53 = vmul.f32 %v190_v49, %v190_v49  ;;  %v192_v54 = vadd.f32 %v191_v50, %v62_v40 }
  0xeb   :  { %v206_v55 = vadd.f32 %v202_v51, %v186_v42  ;;  %v203_v56 = vmul.f32 0.044715, %v199_v52  ;;  %v200_v57 = vmul.f32 %v196_v53, %v190_v49  ;;  %v197_v58 = vmul.f32 %v192_v54, %v192_v54 }
  0xed   :  { %v210_v59 = vmul.f32 0.7978846, %v206_v55  ;;  %v207_v60 = vadd.f32 %v203_v56, %v188_v45  ;;  %v204_v61 = vmul.f32 0.044715, %v200_v57  ;;  %v201_v62 = vmul.f32 %v197_v58, %v192_v54 }
  0xef   :  { %v208_v63 = vadd.f32 %v204_v61, %v190_v49  ;;  %v205_v0 = vmul.f32 0.044715, %v201_v62  ;;  %v211_v1 = vmul.f32 0.7978846, %v207_v60  ;;  %531 = vtanh.f32 %v210_v59 }
  0xf1   :  { %v212_v2 = vmul.f32 0.7978846, %v208_v63  ;;  %v209_v3 = vadd.f32 %v205_v0, %v192_v54  ;;  %533 = vtanh.f32 %v211_v1 }
  0xf3   :  { %535 = vtanh.f32 %v212_v2  ;;  %v213_v4 = vmul.f32 0.7978846, %v209_v3 }
  0xf5   :  { %537 = vtanh.f32 %v213_v4 }
  0xfc   :  { %v532_v5 = vpop.eup %531 }
  0xfd   :  { %v218_v9 = vadd.f32 1.0, %v532_v5 }
  0xfe   :  { %v534_v6 = vpop.eup %533 }
  0xff   :  { %v219_v7 = vadd.f32 1.0, %v534_v6  ;;  %v222_v15 = vmul.f32 0.5, %v218_v9 }
 0x100   :  { %v536_v8 = vpop.eup %535 }
 0x101   :  { %v220_v10 = vadd.f32 1.0, %v536_v8  ;;  %v223_v13 = vmul.f32 0.5, %v219_v7  ;;  %v226_v20 = vmul.f32 %v222_v15, %v186_v42 }
 0x102   :  { %v538_v11 = vpop.eup %537 }
 0x103   :  { %v221_v12 = vadd.f32 1.0, %v538_v11  ;;  %v224_v14 = vmul.f32 0.5, %v220_v10  ;;  %v227_v18 = vmul.f32 %v223_v13, %v188_v45 }
 0x105   :  { %v225_v16 = vmul.f32 0.5, %v221_v12  ;;  %v228_v17 = vmul.f32 %v224_v14, %v190_v49 }
 0x107   :  { %v229_v19 = vmul.f32 %v225_v16, %v192_v54  ;;  %v232_v22 = vpack.c.bf16 %v228_v17, %v226_v20 }
 0x109   :  { %v233_v21 = vpack.c.bf16 %v229_v19, %v227_v18 }
 0x10b   :  { %394 = vmatprep.mubr.bf16.mxu1 %v233_v21 }
 0x10c   :  { %395 = vmatmul.mubr.bf16.vlgmr.msra.gmra.mxu1 %v232_v22 }
 0x1cc   :  { %v480_v23 = vpop.f32.mrf.mxu1 }
 0x1ce   :  { %v481_v25 = vpop.f32.mrf.mxu1 }
 0x1cf   :  { %v482_v26 = vadd.f32 %v481_v25, %v480_v23 }
 0x1d0   :  { %v483_v27 = vpop.f32.mrf.mxu1 }
 0x1d1   :  { %v403_v28 = vadd.f32 %v482_v26, %v430_v24 }
 0x1d2   :  { %v484_v29 = vpop.f32.mrf.mxu1 }
 0x1d3   :  { %412 = vst [vmem:[#allocation3] sm:$0xff] %v403_v28  ;;  %v485_v30 = vadd.f32 %v484_v29, %v483_v27 }
 0x1d5   :  { %v404_v31 = vadd.f32 %v485_v30, %v430_v24 }
 0x1d7   :  { %413 = vst [vmem:[#allocation3 + $0x8] sm:$0xff] %v404_v31 }
 0x1d8   :  { %550 = shalt.err (!%p547_p4)
}
 0x1d9   :  { %s563_s4 = smov 128   ;;  %s564_s10 = smov 8  }
 0x1da   :  { %425 = dma.vmem_to_hbm [thread:$0]  %s420_s0, 256, %s708_s5, [#allocation4], %s563_s4, %s563_s4, %s564_s10  }
 0x1db   :  { %559 = dma.done.wait [#allocation4], 256  }
 0x1dc   :  { %560 = vsyncadd [#allocation4], 4294967040 }
 0x1dd   :  { %429 = vsyncpa [#allocation4], 1 }

</bundles_post_ra>
